<compile_context>
chip_gen: v5e
topology: v5e:2x2
jax: 0.10.0
libtpu: 0.0.40
codegen_flags: <defaults>
</compile_context>

<pallas_src>
import functools

import jax
import jax.numpy as jnp
from jax.experimental import pallas as pl
from jax.experimental.pallas import tpu as pltpu

_LANES = 128
_MAX_TC = 256          # channel tile when C is large (multiple of 8/16/32 and of 128)
_MXU_MIN_TC = 64       # below this an M=1 ones-row dot wastes the MXU -> VPU/XLU path


def _ceil_div(a, b):
    return -(-a // b)


def _vmem_budget():
    """Per-input-buffer budget and scoped-VMEM limit, sized per TPU generation."""
    try:
        cap = int(pltpu.get_tpu_info().vmem_capacity_bytes)
    except Exception:
        cap = 64 * 1024 * 1024          # unknown: assume v7x-like (tightest) VMEM
    if cap >= 96 * 1024 * 1024:         # v5e / v6e: 128 MiB physical VMEM
        per_buffer = 16 * 1024 * 1024
    else:                               # v7x: 64 MiB physical VMEM
        per_buffer = 12 * 1024 * 1024
    # Footprint = 2 input pipeline buffers + tiny accumulator/output blocks + slack.
    vmem_limit = 2 * per_buffer + 4 * 1024 * 1024
    return per_buffer, vmem_limit


def _gap_kernel(x_ref, o_ref, acc_ref, *, hw, need_mask, inv_hw, use_mxu):
    """Reduce one (tc, thw) chunk into the per-channel sum; finalize on the last step."""
    k = pl.program_id(3)
    n_k = pl.num_programs(3)
    # Global HW-chunk index (leading grid axis is the HW split for the 2nd TensorCore).
    g = pl.program_id(0) * n_k + k

    @pl.when(k == 0)
    def _init():
        acc_ref[...] = jnp.zeros_like(acc_ref)

    x = x_ref[0]                        # (tc, thw); kept in input dtype (bf16 ok on MXU)
    tc, thw = x.shape

    def _accumulate(xv):
        if use_mxu:
            # Ones-row MXU dot contracts the lane axis and lands lane-dense as (1, tc);
            # per-step work rides the vector-extended slot and is hidden under the DMA.
            ones_row = jnp.ones((1, thw), dtype=xv.dtype)
            partial = jax.lax.dot_general(
                ones_row, xv,
                dimension_numbers=(((1,), (1,)), ((), ())),
                preferred_element_type=jnp.float32)                      # (1, tc)
        else:
            # Small-C path: VPU/XLU lane reduction (different slots than the DMA).
            partial = jnp.sum(xv.astype(jnp.float32), axis=-1, keepdims=True)  # (tc, 1)
        acc_ref[...] += partial

    if need_mask:
        is_edge = (g + 1) * thw > hw    # only the globally-last chunk overhangs hw

        @pl.when(jnp.logical_not(is_edge))
        def _plain():
            _accumulate(x)

        @pl.when(is_edge)
        def _masked():
            # Zero stale / out-of-range lanes of the overhanging chunk only; the 1/HW
            # scale below always uses the true HW.
            lane = jax.lax.broadcasted_iota(jnp.int32, (1, thw), 1)
            _accumulate(jnp.where(g * thw + lane < hw, x, 0))
    else:
        _accumulate(x)

    @pl.when(k == n_k - 1)
    def _finalize():
        out = (acc_ref[...] * inv_hw).astype(o_ref.dtype)   # partial mean of this split
        if use_mxu:
            o_ref[...] = out.reshape(1, 1, 1, tc)           # lane-dense channels
        else:
            o_ref[...] = out.reshape(1, 1, tc, 1)           # channels on sublanes


def global_avg_pool(x: jax.Array, flatten: bool = False) -> jax.Array:
    """Global average pool over all spatial dims of an NCHW(-like) tensor."""
    B, C = int(x.shape[0]), int(x.shape[1])
    hw = 1
    for d in x.shape[2:]:
        hw *= int(d)

    x_flat = x.reshape(B, C, hw)
    itemsize = x_flat.dtype.itemsize
    per_buffer_bytes, vmem_limit_bytes = _vmem_budget()

    # ---- channel tiling -------------------------------------------------------------
    if C <= _MAX_TC:
        if B == 1 and C > _LANES:
            tc = _LANES        # n_c == 2 so the 2nd v7x core owns channel blocks
        else:
            tc = C             # block == full dim: no (8,128) constraint, no padding
    else:
        tc = _MAX_TC
    n_c = _ceil_div(C, tc)
    # NOTE: if C % tc != 0 the edge channel block reads garbage rows; their sums land in
    # the out-of-range output region which Pallas discards -- no cross-contamination.

    use_mxu = tc >= _MXU_MIN_TC

    # ---- HW tiling (VMEM footprint uses the sublane-padded channel count) ------------
    sublane = 8 * max(1, 4 // itemsize)
    tc_pad = _ceil_div(tc, sublane) * sublane
    max_thw = per_buffer_bytes // (tc_pad * itemsize)
    max_thw = max(_LANES, (max_thw // _LANES) * _LANES)

    if hw <= max_thw:
        thw, n_k, need_mask = hw, 1, False      # single chunk == full dim
    else:
        # Prefer the largest 128-multiple divisor of hw in [max_thw/2, max_thw]:
        # exact tiling removes the mask path and the partial last DMA entirely.
        thw = 0
        if hw % _LANES == 0:
            q = hw // _LANES
            d_hi = min(q, max_thw // _LANES)
            d_lo = max(1, d_hi // 2)
            for d in range(d_hi, d_lo - 1, -1):
                if q % d == 0:
                    thw = d * _LANES
                    break
        if thw:
            n_k, need_mask = hw // thw, False
        else:
            thw = max_thw
            n_k, need_mask = _ceil_div(hw, thw), (hw % thw != 0)

    # ---- HW-reduction split so both TensorCores get work when B*n_c == 1 -------------
    if B * n_c == 1 and n_k >= 2 and n_k % 2 == 0:
        n_s, kps = 2, n_k // 2
    else:
        n_s, kps = 1, n_k

    def in_index_map(s, b, c, k):
        return (b, c, s * kps + k)

    if use_mxu:
        out_shape = jax.ShapeDtypeStruct((n_s, B, 1, C), jnp.float32)
        out_spec = pl.BlockSpec((1, 1, 1, tc), lambda s, b, c, k: (s, b, 0, c))
        acc_shape = pltpu.VMEM((1, tc), jnp.float32)
    else:
        out_shape = jax.ShapeDtypeStruct((n_s, B, C, 1), jnp.float32)
        out_spec = pl.BlockSpec((1, 1, tc, 1), lambda s, b, c, k: (s, b, c, 0))
        acc_shape = pltpu.VMEM((tc, 1), jnp.float32)

    kernel = functools.partial(_gap_kernel, hw=hw, need_mask=need_mask,
                               inv_hw=1.0 / float(hw), use_mxu=use_mxu)

    cost = pl.CostEstimate(
        flops=2 * B * C * hw,                               # one MAC per element
        transcendentals=0,
        bytes_accessed=B * C * hw * itemsize + n_s * B * C * 4)

    out = pl.pallas_call(
        kernel,
        out_shape=out_shape,
        grid_spec=pltpu.PrefetchScalarGridSpec(
            num_scalar_prefetch=0,
            grid=(n_s, B, n_c, kps),                        # HW reduction axis last
            # Double buffering is the right default here (bandwidth-bound); only add
            # pipeline_mode=pl.Buffered(3) if a profile still shows exposed DMA latency.
            in_specs=[pl.BlockSpec((1, tc, thw), in_index_map)],
            out_specs=out_spec,
            scratch_shapes=[acc_shape],
        ),
        compiler_params=pltpu.CompilerParams(
            dimension_semantics=("parallel", "parallel", "parallel", "arbitrary"),
            vmem_limit_bytes=vmem_limit_bytes,
        ),
        cost_estimate=cost,
    )(x_flat)

    # Combine the HW-split partial means (no-op squeeze when n_s == 1) and cast back.
    pooled = out.sum(axis=0).astype(x.dtype)
    if flatten:
        return pooled.reshape(B, C)
    return pooled.reshape(B, C, 1, 1)       # match PyTorch .view(B, C, 1, 1)


if __name__ == "__main__":
    root = jax.random.PRNGKey(0)
    k0, k1, k2 = jax.random.split(root, 3)

    # 1) Small NCHW input consistent with the module (small-C VPU/XLU path, single chunk).
    B, C, H, W = 2, 4, 16, 16
    x = jax.random.normal(k0, (B, C, H, W), dtype=jnp.float32)
    y = jax.block_until_ready(global_avg_pool(x, flatten=False))
    y_flat = jax.block_until_ready(global_avg_pool(x, flatten=True))
    ref = jnp.mean(x.reshape(B, C, -1), axis=-1)
    assert y.shape == (B, C, 1, 1)
    assert y_flat.shape == (B, C)
    assert jnp.allclose(y.reshape(B, C), ref, atol=1e-5, rtol=1e-5)
    assert jnp.allclose(y_flat, ref, atol=1e-5, rtol=1e-5)

    # 2) Wider channels: exercises the per-step ones-row MXU reduction path.
    xb = jax.random.normal(k1, (2, 128, 16, 16), dtype=jnp.float32)
    yb = jax.block_until_ready(global_avg_pool(xb, flatten=True))
    refb = jnp.mean(xb.reshape(2, 128, -1), axis=-1)
    assert jnp.allclose(yb, refb, atol=1e-5, rtol=1e-5)

    # 3) Large spatial extent with B*n_c == 1: exercises multi-chunk accumulation, the
    #    gated remainder mask (true-HW scale) and the two-way HW split + wrapper combine.
    xc = jax.random.normal(k2, (1, 4, 769, 769), dtype=jnp.float32)
    yc = jax.block_until_ready(global_avg_pool(xc, flatten=True))
    refc = jnp.mean(xc.reshape(1, 4, -1), axis=-1)
    assert jnp.allclose(yc, refc, atol=1e-5, rtol=1e-5)

    print("KERNEL_OK")
</pallas_src>

<mosaic_0001>
module attributes {stable_mosaic.version = 11 : i64} {
  func.func @_gap_kernel(%arg0: i32, %arg1: i32, %arg2: i32, %arg3: i32, %arg4: memref<1x4x256xf32, #tpu.memory_space<vmem>>, %arg5: memref<1x1x4x1xf32, #tpu.memory_space<vmem>>, %arg6: memref<4x1xf32, #tpu.memory_space<vmem>>) attributes {dimension_semantics = [#tpu.dimension_semantics<parallel>, #tpu.dimension_semantics<parallel>, #tpu.dimension_semantics<parallel>, #tpu.dimension_semantics<arbitrary>], iteration_bounds = array<i64: 1, 2, 1, 1>, scalar_prefetch = 0 : i64, scratch_operands = 1 : i64, tpu.core_type = #tpu.core_type<tc>, window_params = [{transform_indices = @transform_0, window_bounds = array<i64: 1, 4, 256>}, {transform_indices = @transform_1, window_bounds = array<i64: 1, 1, 4, 1>}]} {
    %c0_i32 = arith.constant 0 : i32
    %0 = arith.cmpi eq, %arg3, %c0_i32 : i32
    %1 = arith.extui %0 : i1 to i32
    %c0_i32_0 = arith.constant 0 : i32
    %2 = arith.cmpi ne, %1, %c0_i32_0 : i32
    scf.if %2 {
      %cst_9 = arith.constant 0.000000e+00 : f32
      %13 = vector.broadcast %cst_9 : f32 to vector<4x1xf32>
      %c0_10 = arith.constant 0 : index
      %c0_11 = arith.constant 0 : index
      %14 = vector.load %arg6[%c0_10, %c0_11] : memref<4x1xf32, #tpu.memory_space<vmem>>, vector<4x1xf32>
      tpu.vector_store %arg6[%c0_10, %c0_11], %13 {strides = array<i32>} : memref<4x1xf32, #tpu.memory_space<vmem>>, vector<4x1xf32>,
    } else {
    }
    %c0 = arith.constant 0 : index
    %c0_1 = arith.constant 0 : index
    %c0_2 = arith.constant 0 : index
    %3 = vector.load %arg4[%c0, %c0_1, %c0_2] : memref<1x4x256xf32, #tpu.memory_space<vmem>>, vector<1x4x256xf32>
    %4 = vector.shape_cast %3 : vector<1x4x256xf32> to vector<4x256xf32>
    %cst = arith.constant dense<0.000000e+00> : vector<4xf32>
    %5 = vector.multi_reduction <add>, %4, %cst [1] : vector<4x256xf32> to vector<4xf32>
    %6 = vector.shape_cast %5 : vector<4xf32> to vector<4x1xf32>
    %c0_3 = arith.constant 0 : index
    %c0_4 = arith.constant 0 : index
    %7 = vector.load %arg6[%c0_3, %c0_4] : memref<4x1xf32, #tpu.memory_space<vmem>>, vector<4x1xf32>
    %8 = arith.addf %7, %6 : vector<4x1xf32>
    %c0_5 = arith.constant 0 : index
    %c0_6 = arith.constant 0 : index
    %9 = vector.load %arg6[%c0_5, %c0_6] : memref<4x1xf32, #tpu.memory_space<vmem>>, vector<4x1xf32>
    tpu.vector_store %arg6[%c0_5, %c0_6], %8 {strides = array<i32>} : memref<4x1xf32, #tpu.memory_space<vmem>>, vector<4x1xf32>,
    %c0_i32_7 = arith.constant 0 : i32
    %10 = arith.cmpi eq, %arg3, %c0_i32_7 : i32
    %11 = arith.extui %10 : i1 to i32
    %c0_i32_8 = arith.constant 0 : i32
    %12 = arith.cmpi ne, %11, %c0_i32_8 : i32
    scf.if %12 {
      %c0_9 = arith.constant 0 : index
      %c0_10 = arith.constant 0 : index
      %13 = vector.load %arg6[%c0_9, %c0_10] : memref<4x1xf32, #tpu.memory_space<vmem>>, vector<4x1xf32>
      %cst_11 = arith.constant 3.906250e-03 : f32
      %14 = vector.broadcast %cst_11 : f32 to vector<4x1xf32>
      %15 = arith.mulf %13, %14 : vector<4x1xf32>
      %16 = vector.shape_cast %15 : vector<4x1xf32> to vector<1x1x4x1xf32>
      %c0_12 = arith.constant 0 : index
      %c0_13 = arith.constant 0 : index
      %c0_14 = arith.constant 0 : index
      %c0_15 = arith.constant 0 : index
      %17 = vector.load %arg5[%c0_12, %c0_13, %c0_14, %c0_15] : memref<1x1x4x1xf32, #tpu.memory_space<vmem>>, vector<1x1x4x1xf32>
      tpu.vector_store %arg5[%c0_12, %c0_13, %c0_14, %c0_15], %16 {strides = array<i32>} : memref<1x1x4x1xf32, #tpu.memory_space<vmem>>, vector<1x1x4x1xf32>,
    } else {
    }
    return
  }
  func.func @transform_0(%arg0: i32, %arg1: i32, %arg2: i32, %arg3: i32) -> (i32, i32, i32) {
    %c1_i32 = arith.constant 1 : i32
    %0 = arith.muli %arg0, %c1_i32 : i32
    %1 = arith.addi %0, %arg3 : i32
    %c0_i32 = arith.constant 0 : i32
    return %arg1, %arg2, %1 : i32, i32, i32
  }
  func.func @transform_1(%arg0: i32, %arg1: i32, %arg2: i32, %arg3: i32) -> (i32, i32, i32, i32) {
    %c0_i32 = arith.constant 0 : i32
    %c0_i32_0 = arith.constant 0 : i32
    return %arg0, %arg1, %arg2, %c0_i32 : i32, i32, i32, i32
  }
}

</mosaic_0001>

<bundles_post_ra>
// kernel: tpu_custom_call.1
= control target key start
LH: loop header
LB: loop body
LE: loop exit
PB: predicated region body
PF: predicated region fallthrough
CT: control target
= control target key end

     0   :  { %6 = vsyncpa [#allocation4], 0  ;;  %s585_s0 = inlined_call_operand.hbm [shape: f32[2,4,256], index: 0, kind: input, shape index: {}]   ;;  %s586_s1 = inlined_call_operand.vmem [shape: f32[1,2,4,1], index: 1, kind: output, shape index: {}]  }
   0x1   :  { %8 = vsyncpa [#allocation4 + $0x1], 0  ;;  %s494_s6 = smov 0   ;;  %s496_s7 = smov 0  }
   0x2   :  { %s498_s8 = smov 0   ;;  %s500_s9 = smov 0  }
   0x3   :  { %s502_s10 = smov 0   ;;  %s504_s11 = smov 0  }
   0x4 LB: > { %s332_s12 = sadd.s32 4294967295, %s481_s11   ;;  %s36_s13 = sadd.s32 1, %s477_s10  ;;  %s481_s11 = sphi %s504_s11, %s14_s11   ;;  %s477_s10 = sphi %s502_s10, %s593_s10   ;;  %s473_s9 = sphi %s500_s9, %s592_s9   ;;  %s469_s8 = sphi %s498_s8, %s591_s8   ;;  %s465_s7 = sphi %s496_s7, %s590_s7   ;;  %s461_s6 = sphi %s494_s6, %s589_s6  }
   0x5   : > { %p38_p0 = scmp.ge.s32.totalorder %s36_s13, 2  ;;  %s53_s14 = sadd.s32 1, %s469_s8 }
   0x6   : > { %p60_p1 = scmp.ne.s32.totalorder %s469_s8, %s465_s7  ;;  %p61_p2 = scmp.eq.s32.totalorder %s481_s11, 0 }
   0x7   : > { %s595_s13 = smov (%p38_p0, %s36_s13), 0  ;;  %p66_p4 = scmp.ne.s32.totalorder %s465_s7, %s461_s6 }
   0x8   : > { %p530_p3 = por %p61_p2, %p60_p1  ;;  %s46_s16 = ssub.s32 %s477_s10, %s595_s13 }
   0x9   : > { %p67_p5 = scmp.eq.s32.totalorder %s332_s12, 0  ;;  %p51_p6 = scmp.eq.s32.totalorder %s46_s16, 0 }
   0xa   : > { %p351_p8 = scmp.lt.s32.totalorder %s481_s11, 2  ;;  %s120_s19 = sand.u32 1, %s469_s8  }
   0xb   : > { %p537_p7 = por %p67_p5, %p66_p4  ;;  %s344_s20 = sshll.u32 %s477_s10, 3 }
   0xc   : > { %s543_s18 = scalar_select %p51_p6, %s469_s8, %s53_s14  }
   0xd   : > { %s336_s21 = sshll.u32 %s120_s19, 3  ;;  %s134_s24 = scalar_lea.hbm %s585_s0, %s344_s20 }
   0xe   : > { %s136_s25 = sshll.u32 %s134_s24, 4  ;;  %s124_s26 = scalar_lea.vmem [#allocation3], %s336_s21  ;;  %s137_s25 = int_to_ptr.hbm [resolvable:$true] %s136_s25 }
   0xf   : > { %s138_s27 = sshll.u32 %s124_s26, 4  ;;  %p348_p9 = pnand %p351_p8, %p530_p3  ;;  %s139_s27 = int_to_ptr.vmem [resolvable:$true] %s138_s27 }
  0x10   : > { %p339_p10 = scmp.ge.s32.totalorder %s481_s11, 1  ;;  %p143_p11 = scmp.lt.s32.totalorder %s481_s11, 3 }
  0x11   : > { %s121_s28 = scalar_lea.sflag [#allocation4], %s120_s19 }
  0x12   : > { %350 = dma.hbm_to_vmem [thread:$0]  (!%p348_p9), %s137_s25, 128, %s139_s27, %s121_s28  }
  0x13   : > { %p144_p12 = pnand %p339_p10, %p143_p11 }
  0x14   : > { %s149_s29 = sand.u32 (!%p144_p12), 1, %s465_s7  }
  0x15   : > { %147 = sbr.rel (%p144_p12) target bundleno = 169 (0xa9), region = 24  ;;  %s340_s30 = sshll.u32 (!%p144_p12), %s149_s29, 3 }
  0x16   : > { %s150_s2 = scalar_lea.sflag (!%p144_p12), [#allocation4], %s149_s29  ;;  %s153_s3 = scalar_lea.vmem (!%p144_p12), [#allocation3], %s340_s30 }
  0x1a   : > { %456 = dma.done.wait (%p537_p7), %s150_s2, 128  }
  0x1b   : > { %458 = vsyncadd (%p537_p7), %s150_s2, 4294967168  ;;  %vm196_vm0 = vcmask 3072   ;;  %v483_v0 = vmov 0.0   ;;  %v198_v1 = vld [vmem:[%s153_s3] sm:$0xff]  ;;  %vm205_vm1 = vcmask 1043456   ;;  %p183_p13 = scmp.lt.s32.totalorder %s473_s9, 1 }
  0x1c   : > { %197 = vst.msk [vmem:[#allocation2] sm:$0xf] %vm196_vm0, %v483_v0 }
  0x1d   : > { %200 = vst [vmem:[#allocation1] ss:$2 sm:$0xff] %v198_v1  ;;  %s597_s9 = smov (!%p183_p13, %s473_s9), 1 }
  0x1e   : > { %s341_s4 = sshll.u32 %s597_s9, 2 }
  0x1f   : > { %s191_s12 = scalar_lea.vmem %s586_s1, %s341_s4 }
  0x23   : > { %v211_v7 = vld [vmem:[#allocation2] sm:$0xf] }
  0x24   : > { %v201_v2 = vld.sshfl [vmem:[#allocation1] sm:$0xff pattern:$0x75316420]  ;;  %v202_v3 = vld.sshfl [vmem:[#allocation1 + $0x8] sm:$0xff pattern:$0x75316420] }
  0x25   : > { %v206_v4 = vsel %vm205_vm1, %v201_v2, 0.0  ;;  %v207_v5 = vsel %vm205_vm1, %v202_v3, 0.0 }
  0x26   : > { %v208_v6 = vadd.f32 %v207_v5, %v206_v4 }
  0x28   : > { %209 = vadd.xlane.f32.xlu0 %v208_v6 }
  0x9b   : > { %v210_v8 = vpop.xlane.xlu0 %209 }
  0x9c   : > { %v212_v9 = vadd.f32 %v211_v7, %v210_v8 }
  0x9e   : > { %214 = vst.msk [vmem:[#allocation2] sm:$0xf] %vm196_vm0, %v212_v9 }
  0xa5   : > { %v218_v10 = vld [vmem:[#allocation2] sm:$0xf] }
  0xa6   : > { %v219_v11 = vmul.f32 0.00390625, %v218_v10 }
  0xa8   : > { %220 = vst.msk [vmem:[%s191_s12] sm:$0xf] %vm196_vm0, %v219_v11 }
  0xa9 PF: > { %s14_s11 = sadd.s32 1, %s481_s11   ;;  %s589_s6 = smov %s465_s7 }
  0xaa   : > { %p11_p0 = scmp.ge.s32.totalorder %s14_s11, 4   ;;  %s590_s7 = smov %s469_s8 }
  0xab   : > { %s591_s8 = smov %s543_s18  ;;  %s592_s9 = smov %s477_s10 }
  0xac   : > { %s593_s10 = smov %s595_s13  ;;  %13 = sbr.rel (!%p11_p0) target bundleno = 4 (0x4), region = 72 }
  0xb1   :  { %254 = vsyncpa [#allocation4], 1 }
  0xb2   :  { %256 = vsyncpa [#allocation4 + $0x1], 1 }

</bundles_post_ra>
